<compile_context>
chip_gen: v5e
topology: v5e:2x2
jax: 0.10.0
libtpu: 0.0.40
codegen_flags: <defaults>
</compile_context>

<pallas_src>
import functools

import jax
import jax.numpy as jnp
from jax.experimental import pallas as pl
from jax.experimental.pallas import tpu as pltpu


def _round_up(n: int, m: int) -> int:
    return ((n + m - 1) // m) * m


def _residual_block_kernel(x_ref, wcat_ref, bcat_ref, w2_ref, b2_ref,
                           g_ref, beta_ref, o_ref,
                           *, hidden_pad: int, d_out_real: int,
                           use_layer_norm: bool, eps: float):
    x = x_ref[...]                                                   # (tb, Din_p) bf16

    # Fused first-layer + skip matmul: x @ [w1 | w_skip]  (bf16 in, f32 accumulate)
    cat = jnp.dot(x, wcat_ref[...],
                  preferred_element_type=jnp.float32) + bcat_ref[...]   # (tb, H_p + Dout_p)

    h = jnp.maximum(cat[:, :hidden_pad], 0.0)                        # ReLU, f32
    skip = cat[:, hidden_pad:]                                       # (tb, Dout_p) f32

    # Second dense layer (dropout = identity in eval mode).
    dense = jnp.dot(h.astype(jnp.bfloat16), w2_ref[...],
                    preferred_element_type=jnp.float32) + b2_ref[...]

    y = dense + skip                                                 # (tb, Dout_p) f32

    if use_layer_norm:
        # Statistics only over the real d_out columns (padded cols are zero, but
        # mask defensively and so the variance is exact).
        col = jax.lax.broadcasted_iota(jnp.int32, y.shape, 1)
        mask = (col < d_out_real).astype(jnp.float32)
        inv_n = 1.0 / float(d_out_real)
        mean = jnp.sum(y * mask, axis=-1, keepdims=True) * inv_n
        diff = (y - mean) * mask
        var = jnp.sum(diff * diff, axis=-1, keepdims=True) * inv_n
        y = diff * jax.lax.rsqrt(var + eps)
        y = y * g_ref[...] + beta_ref[...]

    o_ref[...] = y.astype(o_ref.dtype)


def residual_block(x, params, *, use_layer_norm=True, eps=1e-5, block_b=256):
    """x: (B, D_in) float32. params: dict of weights (see init_params)."""
    B, d_in = x.shape
    hidden = params["w1"].shape[1]
    d_out = params["w2"].shape[1]
    out_dtype = x.dtype

    # Pad feature dims to lane-dense multiples of 128; pad batch to the tile size.
    d_in_p = _round_up(d_in, 128)
    hid_p = _round_up(hidden, 128)
    d_out_p = _round_up(d_out, 128)
    tb = min(block_b, _round_up(B, 8))
    b_p = _round_up(B, tb)
    ncat = hid_p + d_out_p

    def pad2(a, rows, cols):
        return jnp.pad(a, ((0, rows - a.shape[0]), (0, cols - a.shape[1])))

    x_p = pad2(x, b_p, d_in_p).astype(jnp.bfloat16)
    w1_p = pad2(params["w1"], d_in_p, hid_p)
    ws_p = pad2(params["ws"], d_in_p, d_out_p)
    wcat = jnp.concatenate([w1_p, ws_p], axis=1).astype(jnp.bfloat16)   # (Din_p, H_p+Dout_p)
    bcat = jnp.concatenate([pad2(params["b1"], 1, hid_p),
                            pad2(params["bs"], 1, d_out_p)], axis=1).astype(jnp.float32)
    w2_p = pad2(params["w2"], hid_p, d_out_p).astype(jnp.bfloat16)
    b2_p = pad2(params["b2"], 1, d_out_p).astype(jnp.float32)
    g_p = pad2(params["gamma"], 1, d_out_p).astype(jnp.float32)
    bt_p = pad2(params["beta"], 1, d_out_p).astype(jnp.float32)

    kernel = functools.partial(_residual_block_kernel,
                               hidden_pad=hid_p, d_out_real=d_out,
                               use_layer_norm=use_layer_norm, eps=eps)

    # Rough VMEM budget (weights fully resident, 2x buffered) -> raise scoped limit,
    # but never beyond 64 MiB so the same tiling is safe on v7x.
    # TODO(synk): for very large d_in/hidden/d_out (weights >> VMEM) tile the
    # reduction dims over an extra grid axis with an f32 accumulator instead.
    weight_bytes = (wcat.size + w2_p.size) * 2 + (bcat.size + b2_p.size
                                                  + g_p.size + bt_p.size) * 4
    tile_bytes = tb * d_in_p * 2 + tb * d_out_p * 4
    vmem_est = 2 * (weight_bytes + tile_bytes) + 4 * tb * ncat * 4
    vmem_limit = int(min(64 * 2**20, max(32 * 2**20, 2 * vmem_est)))

    cost = pl.CostEstimate(
        flops=2 * b_p * (d_in_p * ncat + hid_p * d_out_p),
        transcendentals=b_p if use_layer_norm else 0,
        bytes_accessed=(x_p.size * 2 + wcat.size * 2 + w2_p.size * 2
                        + (bcat.size + b2_p.size + g_p.size + bt_p.size) * 4
                        + b_p * d_out_p * 4),
    )

    # Weights / biases are small: keep them fully resident in VMEM every step.
    full = lambda shape: pl.BlockSpec(shape, lambda i: (0, 0))

    out = pl.pallas_call(
        kernel,
        out_shape=jax.ShapeDtypeStruct((b_p, d_out_p), out_dtype),
        grid_spec=pltpu.PrefetchScalarGridSpec(
            num_scalar_prefetch=0,
            grid=(b_p // tb,),
            in_specs=[
                pl.BlockSpec((tb, d_in_p), lambda i: (i, 0)),        # x tile (bf16)
                full((d_in_p, ncat)),                                # [w1 | w_skip] (bf16)
                full((1, ncat)),                                     # [b1 | b_skip] (f32)
                full((hid_p, d_out_p)),                              # w2 (bf16)
                full((1, d_out_p)),                                  # b2 (f32)
                full((1, d_out_p)),                                  # ln gamma
                full((1, d_out_p)),                                  # ln beta
            ],
            out_specs=pl.BlockSpec((tb, d_out_p), lambda i: (i, 0)),
        ),
        compiler_params=pltpu.CompilerParams(
            dimension_semantics=("parallel",),
            vmem_limit_bytes=vmem_limit),
        cost_estimate=cost,
    )(x_p, wcat, bcat, w2_p, b2_p, g_p, bt_p)

    return out[:B, :d_out]


def init_params(key, input_dim, output_dim, hidden_size):
    """Deterministic synthetic parameters matching nn.Linear / nn.LayerNorm shapes."""
    ks = jax.random.split(key, 6)
    scale1 = 1.0 / jnp.sqrt(input_dim)
    scale2 = 1.0 / jnp.sqrt(hidden_size)
    return {
        # Linear(input_dim, hidden_size): torch W is (hidden, in); store transposed.
        "w1": jax.random.uniform(ks[0], (input_dim, hidden_size), jnp.float32, -scale1, scale1),
        "b1": jax.random.uniform(ks[1], (1, hidden_size), jnp.float32, -scale1, scale1),
        # Linear(hidden_size, output_dim)
        "w2": jax.random.uniform(ks[2], (hidden_size, output_dim), jnp.float32, -scale2, scale2),
        "b2": jax.random.uniform(ks[3], (1, output_dim), jnp.float32, -scale2, scale2),
        # skip Linear(input_dim, output_dim)
        "ws": jax.random.uniform(ks[4], (input_dim, output_dim), jnp.float32, -scale1, scale1),
        "bs": jax.random.uniform(ks[5], (1, output_dim), jnp.float32, -scale1, scale1),
        # LayerNorm(output_dim) default init
        "gamma": jnp.ones((1, output_dim), jnp.float32),
        "beta": jnp.zeros((1, output_dim), jnp.float32),
    }


def residual_block_ref(x, params, *, use_layer_norm=True, eps=1e-5):
    """Pure-JAX f32 reference for correctness checking."""
    h = jnp.maximum(x @ params["w1"] + params["b1"], 0.0)
    dense = h @ params["w2"] + params["b2"]
    skip = x @ params["ws"] + params["bs"]
    y = dense + skip
    if use_layer_norm:
        mean = jnp.mean(y, axis=-1, keepdims=True)
        var = jnp.mean(jnp.square(y - mean), axis=-1, keepdims=True)
        y = (y - mean) / jnp.sqrt(var + eps)
        y = y * params["gamma"] + params["beta"]
    return y


if __name__ == "__main__":
    batch, input_dim, hidden_size, output_dim = 16, 32, 64, 32

    key = jax.random.PRNGKey(0)
    kx, kp = jax.random.split(key)
    x = jax.random.normal(kx, (batch, input_dim), jnp.float32)
    params = init_params(kp, input_dim, output_dim, hidden_size)

    # bf16 matmuls with f32 accumulation -> loosen tolerance vs. f32 reference.
    out_ln = jax.block_until_ready(residual_block(x, params, use_layer_norm=True))
    ref_ln = residual_block_ref(x, params, use_layer_norm=True)
    assert out_ln.shape == (batch, output_dim)
    assert jnp.allclose(out_ln, ref_ln, atol=2e-2, rtol=2e-2), "LN mismatch vs reference"

    out_no = jax.block_until_ready(residual_block(x, params, use_layer_norm=False))
    ref_no = residual_block_ref(x, params, use_layer_norm=False)
    assert jnp.allclose(out_no, ref_no, atol=2e-2, rtol=2e-2), "no-LN mismatch vs reference"

    # TODO(synk): dropout implemented as identity (eval mode); training-mode dropout
    # would use pltpu.prng_seed / pltpu.prng_random_bits to build a keep-mask.
    print("KERNEL_OK")
</pallas_src>

<mosaic_0001>
module attributes {stable_mosaic.version = 11 : i64} {
  func.func @_residual_block_kernel(%arg0: i32, %arg1: memref<16x128xbf16, #tpu.memory_space<vmem>>, %arg2: memref<128x256xbf16, #tpu.memory_space<vmem>>, %arg3: memref<1x256xf32, #tpu.memory_space<vmem>>, %arg4: memref<128x128xbf16, #tpu.memory_space<vmem>>, %arg5: memref<1x128xf32, #tpu.memory_space<vmem>>, %arg6: memref<1x128xf32, #tpu.memory_space<vmem>>, %arg7: memref<1x128xf32, #tpu.memory_space<vmem>>, %arg8: memref<16x128xf32, #tpu.memory_space<vmem>>) attributes {dimension_semantics = [#tpu.dimension_semantics<parallel>], iteration_bounds = array<i64: 1>, scalar_prefetch = 0 : i64, scratch_operands = 0 : i64, tpu.core_type = #tpu.core_type<tc>, window_params = [{transform_indices = @transform_0, window_bounds = array<i64: 16, 128>}, {pipeline_mode = #tpu.pipeline_mode<synchronous>, transform_indices = @transform_1, window_bounds = array<i64: 128, 256>}, {pipeline_mode = #tpu.pipeline_mode<synchronous>, transform_indices = @transform_2, window_bounds = array<i64: 1, 256>}, {pipeline_mode = #tpu.pipeline_mode<synchronous>, transform_indices = @transform_3, window_bounds = array<i64: 128, 128>}, {pipeline_mode = #tpu.pipeline_mode<synchronous>, transform_indices = @transform_4, window_bounds = array<i64: 1, 128>}, {pipeline_mode = #tpu.pipeline_mode<synchronous>, transform_indices = @transform_5, window_bounds = array<i64: 1, 128>}, {pipeline_mode = #tpu.pipeline_mode<synchronous>, transform_indices = @transform_6, window_bounds = array<i64: 1, 128>}, {transform_indices = @transform_7, window_bounds = array<i64: 16, 128>}]} {
    %c0 = arith.constant 0 : index
    %c0_0 = arith.constant 0 : index
    %0 = vector.load %arg1[%c0, %c0_0] : memref<16x128xbf16, #tpu.memory_space<vmem>>, vector<16x128xbf16>
    %c0_1 = arith.constant 0 : index
    %c0_2 = arith.constant 0 : index
    %1 = vector.load %arg2[%c0_1, %c0_2] : memref<128x256xbf16, #tpu.memory_space<vmem>>, vector<128x256xbf16>
    %cst = arith.constant dense<0.000000e+00> : vector<16x256xf32>
    %2 = tpu.matmul %0, %1, %cst {dimension_numbers = #tpu.dot_dimension_numbers<[1], [0], [0], [1], [0, 0, 1, 1], [], []>} : vector<16x128xbf16>, vector<128x256xbf16>, vector<16x256xf32> -> vector<16x256xf32>
    %c0_3 = arith.constant 0 : index
    %c0_4 = arith.constant 0 : index
    %3 = vector.load %arg3[%c0_3, %c0_4] : memref<1x256xf32, #tpu.memory_space<vmem>>, vector<1x256xf32>
    %4 = vector.broadcast %3 : vector<1x256xf32> to vector<16x256xf32>
    %5 = arith.addf %2, %4 : vector<16x256xf32>
    %6 = vector.extract_strided_slice %5 {offsets = [0, 0], sizes = [16, 128], strides = [1, 1]} : vector<16x256xf32> to vector<16x128xf32>
    %cst_5 = arith.constant 0.000000e+00 : f32
    %7 = vector.broadcast %cst_5 : f32 to vector<16x128xf32>
    %8 = arith.maximumf %6, %7 : vector<16x128xf32>
    %9 = vector.extract_strided_slice %5 {offsets = [0, 128], sizes = [16, 128], strides = [1, 1]} : vector<16x256xf32> to vector<16x128xf32>
    %10 = arith.truncf %8 : vector<16x128xf32> to vector<16x128xbf16>
    %c0_6 = arith.constant 0 : index
    %c0_7 = arith.constant 0 : index
    %11 = vector.load %arg4[%c0_6, %c0_7] : memref<128x128xbf16, #tpu.memory_space<vmem>>, vector<128x128xbf16>
    %cst_8 = arith.constant dense<0.000000e+00> : vector<16x128xf32>
    %12 = tpu.matmul %10, %11, %cst_8 {dimension_numbers = #tpu.dot_dimension_numbers<[1], [0], [0], [1], [0, 0, 1, 1], [], []>} : vector<16x128xbf16>, vector<128x128xbf16>, vector<16x128xf32> -> vector<16x128xf32>
    %c0_9 = arith.constant 0 : index
    %c0_10 = arith.constant 0 : index
    %13 = vector.load %arg5[%c0_9, %c0_10] : memref<1x128xf32, #tpu.memory_space<vmem>>, vector<1x128xf32>
    %14 = vector.broadcast %13 : vector<1x128xf32> to vector<16x128xf32>
    %15 = arith.addf %12, %14 : vector<16x128xf32>
    %16 = arith.addf %15, %9 : vector<16x128xf32>
    %17 = tpu.iota {dimensions = array<i32: 1>} : vector<16x128xi32>
    %c32_i32 = arith.constant 32 : i32
    %18 = vector.broadcast %c32_i32 : i32 to vector<16x128xi32>
    %19 = arith.cmpi slt, %17, %18 : vector<16x128xi32>
    %20 = arith.extui %19 : vector<16x128xi1> to vector<16x128xi32>
    %21 = arith.sitofp %20 : vector<16x128xi32> to vector<16x128xf32>
    %22 = arith.mulf %16, %21 : vector<16x128xf32>
    %cst_11 = arith.constant dense<0.000000e+00> : vector<16xf32>
    %23 = vector.multi_reduction <add>, %22, %cst_11 [1] : vector<16x128xf32> to vector<16xf32>
    %24 = vector.shape_cast %23 : vector<16xf32> to vector<16x1xf32>
    %cst_12 = arith.constant 3.125000e-02 : f32
    %25 = vector.broadcast %cst_12 : f32 to vector<16x1xf32>
    %26 = arith.mulf %24, %25 : vector<16x1xf32>
    %27 = vector.broadcast %26 : vector<16x1xf32> to vector<16x128xf32>
    %28 = arith.subf %16, %27 : vector<16x128xf32>
    %29 = arith.mulf %28, %21 : vector<16x128xf32>
    %30 = arith.mulf %29, %29 : vector<16x128xf32>
    %cst_13 = arith.constant dense<0.000000e+00> : vector<16xf32>
    %31 = vector.multi_reduction <add>, %30, %cst_13 [1] : vector<16x128xf32> to vector<16xf32>
    %32 = vector.shape_cast %31 : vector<16xf32> to vector<16x1xf32>
    %cst_14 = arith.constant 3.125000e-02 : f32
    %33 = vector.broadcast %cst_14 : f32 to vector<16x1xf32>
    %34 = arith.mulf %32, %33 : vector<16x1xf32>
    %cst_15 = arith.constant 9.99999974E-6 : f32
    %35 = vector.broadcast %cst_15 : f32 to vector<16x1xf32>
    %36 = arith.addf %34, %35 : vector<16x1xf32>
    %37 = math.rsqrt %36 : vector<16x1xf32>
    %38 = vector.broadcast %37 : vector<16x1xf32> to vector<16x128xf32>
    %39 = arith.mulf %29, %38 : vector<16x128xf32>
    %c0_16 = arith.constant 0 : index
    %c0_17 = arith.constant 0 : index
    %40 = vector.load %arg6[%c0_16, %c0_17] : memref<1x128xf32, #tpu.memory_space<vmem>>, vector<1x128xf32>
    %41 = vector.broadcast %40 : vector<1x128xf32> to vector<16x128xf32>
    %42 = arith.mulf %39, %41 : vector<16x128xf32>
    %c0_18 = arith.constant 0 : index
    %c0_19 = arith.constant 0 : index
    %43 = vector.load %arg7[%c0_18, %c0_19] : memref<1x128xf32, #tpu.memory_space<vmem>>, vector<1x128xf32>
    %44 = vector.broadcast %43 : vector<1x128xf32> to vector<16x128xf32>
    %45 = arith.addf %42, %44 : vector<16x128xf32>
    %c0_20 = arith.constant 0 : index
    %c0_21 = arith.constant 0 : index
    %46 = vector.load %arg8[%c0_20, %c0_21] : memref<16x128xf32, #tpu.memory_space<vmem>>, vector<16x128xf32>
    tpu.vector_store %arg8[%c0_20, %c0_21], %45 {strides = array<i32>} : memref<16x128xf32, #tpu.memory_space<vmem>>, vector<16x128xf32>,
    return
  }
  func.func @transform_0(%arg0: i32) -> (i32, i32) {
    %c0_i32 = arith.constant 0 : i32
    %c0_i32_0 = arith.constant 0 : i32
    return %arg0, %c0_i32 : i32, i32
  }
  func.func @transform_1(%arg0: i32) -> (i32, i32) {
    %c0_i32 = arith.constant 0 : i32
    %c0_i32_0 = arith.constant 0 : i32
    %c0_i32_1 = arith.constant 0 : i32
    return %c0_i32, %c0_i32_0 : i32, i32
  }
  func.func @transform_2(%arg0: i32) -> (i32, i32) {
    %c0_i32 = arith.constant 0 : i32
    %c0_i32_0 = arith.constant 0 : i32
    %c0_i32_1 = arith.constant 0 : i32
    return %c0_i32, %c0_i32_0 : i32, i32
  }
  func.func @transform_3(%arg0: i32) -> (i32, i32) {
    %c0_i32 = arith.constant 0 : i32
    %c0_i32_0 = arith.constant 0 : i32
    %c0_i32_1 = arith.constant 0 : i32
    return %c0_i32, %c0_i32_0 : i32, i32
  }
  func.func @transform_4(%arg0: i32) -> (i32, i32) {
    %c0_i32 = arith.constant 0 : i32
    %c0_i32_0 = arith.constant 0 : i32
    %c0_i32_1 = arith.constant 0 : i32
    return %c0_i32, %c0_i32_0 : i32, i32
  }
  func.func @transform_5(%arg0: i32) -> (i32, i32) {
    %c0_i32 = arith.constant 0 : i32
    %c0_i32_0 = arith.constant 0 : i32
    %c0_i32_1 = arith.constant 0 : i32
    return %c0_i32, %c0_i32_0 : i32, i32
  }
  func.func @transform_6(%arg0: i32) -> (i32, i32) {
    %c0_i32 = arith.constant 0 : i32
    %c0_i32_0 = arith.constant 0 : i32
    %c0_i32_1 = arith.constant 0 : i32
    return %c0_i32, %c0_i32_0 : i32, i32
  }
  func.func @transform_7(%arg0: i32) -> (i32, i32) {
    %c0_i32 = arith.constant 0 : i32
    %c0_i32_0 = arith.constant 0 : i32
    return %arg0, %c0_i32 : i32, i32
  }
}

</mosaic_0001>

<bundles_post_ra>
// kernel: tpu_custom_call.1
= control target key start
LH: loop header
LB: loop body
LE: loop exit
PB: predicated region body
PF: predicated region fallthrough
CT: control target
= control target key end

     0   :  { %12 = vsyncpa [#allocation3], 0  ;;  %s748_s0 = inlined_call_operand.hbm [shape: bf16[16,128], index: 0, kind: input, shape index: {}]   ;;  %s749_s1 = inlined_call_operand.hbm [shape: bf16[128,256], index: 1, kind: input, shape index: {}]   ;;  %s750_s2 = inlined_call_operand.hbm [shape: f32[1,256], index: 2, kind: input, shape index: {}]   ;;  %s751_s3 = inlined_call_operand.hbm [shape: bf16[128,128], index: 3, kind: input, shape index: {}]   ;;  %s752_s4 = inlined_call_operand.vmem [shape: f32[1,128], index: 4, kind: input, shape index: {}]   ;;  %s753_s5 = inlined_call_operand.vmem [shape: f32[1,128], index: 5, kind: input, shape index: {}]   ;;  %s754_s6 = inlined_call_operand.vmem [shape: f32[1,128], index: 6, kind: input, shape index: {}]   ;;  %s755_s7 = inlined_call_operand.hbm [shape: f32[16,128], index: 7, kind: output, shape index: {}]  }
   0x1   :  { %13 = vsyncpa [#allocation6], 0 }
   0x2   :  { %14 = vsyncpa [#allocation9], 0  ;;  %s33_s26 = sshll.u32 %s749_s1, 4  ;;  %s34_s26 = int_to_ptr.hbm [resolvable:$true] %s33_s26 }
   0x3   :  { %15 = vsyncpa [#allocation4], 0  ;;  %s668_s27 = smov [#allocation5]   ;;  %s20_s8 = sshll.u32 %s748_s0, 4  ;;  %s21_s8 = int_to_ptr.hbm [resolvable:$true] %s20_s8 }
   0x4   :  { %s35_s28 = sshll.u32 %s668_s27, 4  ;;  %s669_s9 = smov 128   ;;  %s36_s28 = int_to_ptr.vmem [resolvable:$true] %s35_s28 }
   0x5   :  { %s670_s10 = smov 8   ;;  %s671_s11 = smov [#allocation2]  }
   0x6   :  { %41 = dma.hbm_to_vmem [thread:$0]  %s34_s26, 2048, %s36_s28, [#allocation6], %s669_s9, %s669_s9, %s670_s10  }
   0x7   :  { %s22_s12 = sshll.u32 %s671_s11, 4  ;;  %s672_s1 = smov 64   ;;  %s23_s12 = int_to_ptr.vmem [resolvable:$true] %s22_s12 }
   0x8   :  { %s673_s13 = smov 4   ;;  %s47_s16 = sshll.u32 %s750_s2, 4  ;;  %s48_s16 = int_to_ptr.hbm [resolvable:$true] %s47_s16 }
   0x9   :  { %28 = dma.hbm_to_vmem [thread:$0]  %s21_s8, 128, %s23_s12, [#allocation3], %s672_s1, %s672_s1, %s673_s13  }
   0xa   :  { %s674_s17 = smov [#allocation7]   ;;  %s57_s20 = sshll.u32 %s751_s3, 4  ;;  %s58_s20 = int_to_ptr.hbm [resolvable:$true] %s57_s20 }
   0xb   :  { %s49_s0 = sshll.u32 %s674_s17, 4  ;;  %s675_s21 = smov [#allocation8]   ;;  %s50_s0 = int_to_ptr.vmem [resolvable:$true] %s49_s0 }
   0xc   :  { %52 = dma.hbm_to_vmem [thread:$0]  %s48_s16, 32, %s50_s0, [#allocation6]  }
   0xd   :  { %s59_s22 = sshll.u32 %s675_s21, 4  ;;  %s60_s22 = int_to_ptr.vmem [resolvable:$true] %s59_s22 }
   0xe   :  { %65 = dma.hbm_to_vmem [thread:$0]  %s58_s20, 1024, %s60_s22, [#allocation9], %s672_s1, %s672_s1, %s673_s13  }
   0xf   :  { %660 = dma.done.wait [#allocation3], 128  }
  0x10   :  { %661 = vsyncadd [#allocation3], 4294967168 }
  0x11   :  { %662 = dma.done.wait [#allocation6], 2080  }
  0x12   :  { %663 = vsyncadd [#allocation6], 4294965216 }
  0x13   :  { %664 = dma.done.wait [#allocation9], 1024  }
  0x14   :  { %665 = vsyncadd [#allocation9], 4294966272  ;;  %v459_v0 = vld [vmem:[#allocation5 + $0x70] sm:$0xf]  ;;  %v514_v1 = vld [vmem:[#allocation5 + $0x74] sm:$0xf0] }
  0x15   :  { %v451_v2 = vld [vmem:[#allocation5 + $0x60] sm:$0xf]  ;;  %v460_v3 = vor.u32 %v514_v1, %v459_v0  ;;  %v512_v4 = vld [vmem:[#allocation5 + $0x64] sm:$0xf0]  ;;  %v443_v6 = vld [vmem:[#allocation5 + $0x50] sm:$0xf] }
  0x16   :  { %v452_v5 = vor.u32 %v512_v4, %v451_v2  ;;  %v510_v7 = vld [vmem:[#allocation5 + $0x54] sm:$0xf0]  ;;  %v513_v8 = vld [vmem:[#allocation5 + $0x74] sm:$0xf]  ;;  %v461_v9 = vld [vmem:[#allocation5 + $0x78] sm:$0xf0]  ;;  %v313_v2 = vlaneseq }
  0x17   :  { %198 = vmatpush.bf16.msra.mxu0 %v460_v3  ;;  %v522_v10 = vld [vmem:[#allocation8 + $0x38] sm:$0xff]  ;;  %v511_v11 = vld [vmem:[#allocation5 + $0x64] sm:$0xf]  ;;  %v444_v12 = vor.u32 %v510_v7, %v443_v6  ;;  %v464_v13 = vor.u32 %v513_v8, %v461_v9  ;;  %v453_v14 = vld [vmem:[#allocation5 + $0x68] sm:$0xf0]  ;;  %s677_s26 = smov [#allocation10]  }
  0x18   :  { %v435_v15 = vld [vmem:[#allocation5 + $0x40] sm:$0xf]  ;;  %v508_v16 = vld [vmem:[#allocation5 + $0x44] sm:$0xf0]  ;;  %297 = vmatpush.bf16.msra.mxu2 %v522_v10  ;;  %v521_v17 = vld [vmem:[#allocation8 + $0x30] sm:$0xff]  ;;  %v456_v18 = vor.u32 %v511_v11, %v453_v14  ;;  %v314_v4 = vand.u32 127, %v313_v2 }
  0x19   :  { %212 = vmatpush.bf16.msra.mxu1 %v464_v13  ;;  %v509_v19 = vld [vmem:[#allocation5 + $0x54] sm:$0xf]  ;;  %v445_v20 = vld [vmem:[#allocation5 + $0x58] sm:$0xf0]  ;;  %v436_v21 = vor.u32 %v508_v16, %v435_v15  ;;  %v427_v22 = vld [vmem:[#allocation5 + $0x30] sm:$0xf] }
  0x1a   :  { %v506_v23 = vld [vmem:[#allocation5 + $0x34] sm:$0xf0]  ;;  %v520_v24 = vld [vmem:[#allocation8 + $0x28] sm:$0xff]  ;;  %v448_v25 = vor.u32 %v509_v19, %v445_v20  ;;  %v507_v26 = vld [vmem:[#allocation5 + $0x44] sm:$0xf]  ;;  %vm315_vm0 = vcmp.lt.s32.totalorder %v314_v4, 32 }
  0x1b   :  { %199 = vmatpush.bf16.msra.mxu0 %v452_v5  ;;  %v437_v27 = vld [vmem:[#allocation5 + $0x48] sm:$0xf0]  ;;  %v428_v28 = vor.u32 %v506_v23, %v427_v22  ;;  %v419_v29 = vld [vmem:[#allocation5 + $0x20] sm:$0xf]  ;;  %v504_v30 = vld [vmem:[#allocation5 + $0x24] sm:$0xf0] }
  0x1c   :  { %298 = vmatpush.bf16.msra.mxu2 %v521_v17  ;;  %v519_v31 = vld [vmem:[#allocation8 + $0x20] sm:$0xff]  ;;  %v440_v32 = vor.u32 %v507_v26, %v437_v27  ;;  %v505_v33 = vld [vmem:[#allocation5 + $0x34] sm:$0xf]  ;;  %v429_v34 = vld [vmem:[#allocation5 + $0x38] sm:$0xf0]  ;;  %v420_v35 = vor.u32 %v504_v30, %v419_v29  ;;  %v676_v10 = vmov 0.0  }
  0x1d   :  { %213 = vmatpush.bf16.msra.mxu1 %v456_v18  ;;  %v411_v36 = vld [vmem:[#allocation5 + $0x10] sm:$0xf]  ;;  %v502_v37 = vld [vmem:[#allocation5 + $0x14] sm:$0xf0]  ;;  %v432_v38 = vor.u32 %v505_v33, %v429_v34  ;;  %v403_v40 = vld [vmem:[#allocation5] sm:$0xf] }
  0x1e   :  { %v412_v39 = vor.u32 %v502_v37, %v411_v36  ;;  %v500_v41 = vld [vmem:[#allocation5 + $0x4] sm:$0xf0]  ;;  %v498_v43 = vld [vmem:[#allocation2] sm:$0xff]  ;;  %v503_v45 = vld [vmem:[#allocation5 + $0x24] sm:$0xf]  ;;  %v497_v11 = vsel %vm315_vm0, 1.0, %v676_v10 }
  0x1f   :  { %200 = vmatpush.bf16.msra.mxu0 %v444_v12  ;;  %v404_v42 = vor.u32 %v500_v41, %v403_v40  ;;  %v518_v44 = vld [vmem:[#allocation8 + $0x18] sm:$0xff]  ;;  %v421_v46 = vld [vmem:[#allocation5 + $0x28] sm:$0xf0]  ;;  %v517_v48 = vld [vmem:[#allocation8 + $0x10] sm:$0xff]  ;;  %s382_s29 = sshll.u32 %s755_s7, 4  ;;  %s383_s29 = int_to_ptr.hbm [resolvable:$true] %s382_s29 }
  0x20   :  { %299 = vmatpush.bf16.msra.mxu2 %v520_v24  ;;  %v424_v47 = vor.u32 %v503_v45, %v421_v46  ;;  %v501_v49 = vld [vmem:[#allocation5 + $0x14] sm:$0xf]  ;;  %v413_v50 = vld [vmem:[#allocation5 + $0x18] sm:$0xf0]  ;;  %v516_v52 = vld [vmem:[#allocation8 + $0x8] sm:$0xff] }
  0x21   :  { %214 = vmatpush.bf16.msra.mxu1 %v448_v25  ;;  %v416_v51 = vor.u32 %v501_v49, %v413_v50  ;;  %v499_v53 = vld [vmem:[#allocation5 + $0x4] sm:$0xf]  ;;  %v405_v54 = vld [vmem:[#allocation5 + $0x8] sm:$0xf0]  ;;  %v106_v57 = vld [vmem:[#allocation7] sm:$0x3] }
  0x22   :  { %v408_v55 = vor.u32 %v499_v53, %v405_v54  ;;  %v515_v56 = vld [vmem:[#allocation8] sm:$0xff]  ;;  %v108_v59 = vperm.slane %v106_v57, 0  ;;  %v109_v3 = vperm.slane %v106_v57, 1  ;;  %v533_v6 = vld [vmem:[%s752_s4] ss:$0 sm:$0xff] }
  0x23   :  { %201 = vmatpush.bf16.msra.mxu0 %v436_v21 }
  0x24   :  { %300 = vmatpush.bf16.msra.mxu2 %v519_v31 }
  0x25   :  { %215 = vmatpush.bf16.msra.mxu1 %v440_v32 }
  0x27   :  { %202 = vmatpush.bf16.msra.mxu0 %v428_v28 }
  0x28   :  { %301 = vmatpush.bf16.msra.mxu2 %v518_v44  ;;  %v534_v44 = vld [vmem:[%s753_s5] ss:$0 sm:$0xff]  ;;  %s380_s5 = sshll.u32 %s677_s26, 4  ;;  %s381_s5 = int_to_ptr.vmem [resolvable:$true] %s380_s5 }
  0x29   :  { %216 = vmatpush.bf16.msra.mxu1 %v432_v38 }
  0x2b   :  { %203 = vmatpush.bf16.msra.mxu0 %v420_v35 }
  0x2c   :  { %302 = vmatpush.bf16.msra.mxu2 %v517_v48  ;;  %v535_v48 = vld [vmem:[%s754_s6] ss:$0 sm:$0xff] }
  0x2d   :  { %217 = vmatpush.bf16.msra.mxu1 %v424_v47 }
  0x2f   :  { %204 = vmatpush.bf16.msra.mxu0 %v412_v39 }
  0x30   :  { %303 = vmatpush.bf16.msra.mxu2 %v516_v52 }
  0x31   :  { %218 = vmatpush.bf16.msra.mxu1 %v416_v51 }
  0x33   :  { %205 = vmatpush.bf16.msra.mxu0 %v404_v42 }
  0x34   :  { %304 = vmatpush.bf16.msra.mxu2 %v515_v56 }
  0x35   :  { %219 = vmatpush.bf16.msra.mxu1 %v408_v55 }
  0x36   :  { %206 = vmatmul.bf16.vlgmr.msra.gmra.mxu0 %v498_v43 }
  0x38   :  { %220 = vmatmul.bf16.vlgmr.msra.gmra.mxu1 %v498_v43 }
  0xb3   :  { %v207_v58 = vpop.f32.mrf.mxu0 }
  0xb4   :  { %v208_v60 = vadd.f32 %v207_v58, %v108_v59 }
  0xb5   :  { %v221_v5 = vpop.f32.mrf.mxu1 }
  0xb6   :  { %v226_v63 = vmax.f32 %v208_v60, 0.0  ;;  %v222_v7 = vadd.f32 %v221_v5, %v109_v3 }
  0xbb   :  { %v209_v61 = vpop.f32.mrf.mxu0 }
  0xbc   :  { %v210_v62 = vadd.f32 %v209_v61, %v108_v59 }
  0xbd   :  { %v223_v14 = vpop.f32.mrf.mxu1 }
  0xbe   :  { %v227_v0 = vmax.f32 %v210_v62, 0.0  ;;  %v224_v16 = vadd.f32 %v223_v14, %v109_v3 }
  0xc0   :  { %v228_v1 = vpack.c.bf16 %v227_v0, %v226_v63 }
  0xc2   :  { %305 = vmatmul.bf16.vlgmr.msra.gmra.mxu2 %v228_v1 }
 0x145   :  { %v306_v8 = vpop.f32.mrf.mxu2 }
 0x146   :  { %v307_v9 = vadd.f32 %v533_v6, %v306_v8 }
 0x148   :  { %v311_v12 = vadd.f32 %v307_v9, %v222_v7 }
 0x14a   :  { %v318_v13 = vmul.f32 %v497_v11, %v311_v12 }
 0x14c   :  { %320 = vadd.xlane.f32.xlu0 %v318_v13 }
 0x14d   :  { %v308_v15 = vpop.f32.mrf.mxu2 }
 0x14e   :  { %v309_v17 = vadd.f32 %v533_v6, %v308_v15 }
 0x150   :  { %v312_v18 = vadd.f32 %v309_v17, %v224_v16 }
 0x152   :  { %v319_v19 = vmul.f32 %v497_v11, %v312_v18 }
 0x154   :  { %322 = vadd.xlane.f32.xlu0 %v319_v19 }
 0x1bf   :  { %v321_v20 = vpop.xlane.xlu0 %320 }
 0x1c0   :  { %v324_v21 = vmul.f32 0.03125, %v321_v20 }
 0x1c2   :  { %v326_v22 = vsub.f32 %v311_v12, %v324_v21 }
 0x1c4   :  { %v328_v23 = vmul.f32 %v497_v11, %v326_v22 }
 0x1c6   :  { %v330_v24 = vmul.f32 %v328_v23, %v328_v23 }
 0x1c7   :  { %v323_v25 = vpop.xlane.xlu0 %322 }
 0x1c8   :  { %v325_v26 = vmul.f32 0.03125, %v323_v25  ;;  %332 = vadd.xlane.f32.xlu1 %v330_v24 }
 0x1ca   :  { %v327_v27 = vsub.f32 %v312_v18, %v325_v26 }
 0x1cc   :  { %v329_v28 = vmul.f32 %v497_v11, %v327_v27 }
 0x1ce   :  { %v331_v29 = vmul.f32 %v329_v28, %v329_v28 }
 0x1d0   :  { %334 = vadd.xlane.f32.xlu1 %v331_v29 }
 0x23b   :  { %v333_v30 = vpop.xlane.xlu1 %332 }
 0x23c   :  { %v336_v31 = vmul.f32 0.03125, %v333_v30 }
 0x23e   :  { %v338_v32 = vadd.f32 1e-05, %v336_v31 }
 0x240   :  { %536 = vrsqrt.f32 %v338_v32  ;;  %vm346_vm2 = vweird.f32 %v338_v32 }
 0x243   :  { %v335_v33 = vpop.xlane.xlu1 %334 }
 0x244   :  { %v337_v34 = vmul.f32 0.03125, %v335_v33 }
 0x246   :  { %v537_v35 = vpop.eup %536  ;;  %v339_v36 = vadd.f32 1e-05, %v337_v34 }
 0x247   :  { %v341_v37 = vmul.f32 %v537_v35, %v338_v32  ;;  %vm347_vm1 = vweird.f32 %v537_v35 }
 0x248   :  { %538 = vrsqrt.f32 %v339_v36  ;;  %vm348_vm3 = vmor %vm346_vm2, %vm347_vm1  ;;  %vm356_vm5 = vweird.f32 %v339_v36 }
 0x249   :  { %v342_v38 = vmul.f32 %v537_v35, %v341_v37 }
 0x24b   :  { %v343_v39 = vmul.f32 0.5, %v342_v38 }
 0x24d   :  { %v344_v40 = vsub.f32 1.5, %v343_v39 }
 0x24e   :  { %v539_v41 = vpop.eup %538 }
 0x24f   :  { %v345_v42 = vmul.f32 %v537_v35, %v344_v40  ;;  %v351_v43 = vmul.f32 %v539_v41, %v339_v36  ;;  %vm357_vm4 = vweird.f32 %v539_v41 }
 0x250   :  { %vm358_vm6 = vmor %vm356_vm5, %vm357_vm4 }
 0x251   :  { %v349_v45 = vsel %vm348_vm3, %v537_v35, %v345_v42  ;;  %v352_v46 = vmul.f32 %v539_v41, %v351_v43 }
 0x252   :  { %v360_v47 = vmul.f32 %v349_v45, %v328_v23 }
 0x253   :  { %v353_v49 = vmul.f32 0.5, %v352_v46 }
 0x254   :  { %v366_v50 = vmul.f32 %v534_v44, %v360_v47 }
 0x255   :  { %v354_v51 = vsub.f32 1.5, %v353_v49 }
 0x256   :  { %v372_v52 = vadd.f32 %v535_v48, %v366_v50 }
 0x257   :  { %v355_v53 = vmul.f32 %v539_v41, %v354_v51 }
 0x258   :  { %374 = vst [vmem:[#allocation10] sm:$0xff] %v372_v52 }
 0x259   :  { %v359_v54 = vsel %vm358_vm6, %v539_v41, %v355_v53 }
 0x25a   :  { %v361_v55 = vmul.f32 %v359_v54, %v329_v28 }
 0x25c   :  { %v367_v56 = vmul.f32 %v534_v44, %v361_v55 }
 0x25e   :  { %v373_v57 = vadd.f32 %v535_v48, %v367_v56 }
 0x260   :  { %375 = vst [vmem:[#allocation10 + $0x8] sm:$0xff] %v373_v57 }
 0x261   :  { %388 = dma.vmem_to_hbm [thread:$0]  %s381_s5, 256, %s383_s29, [#allocation4], %s669_s9, %s669_s9, %s670_s10  }
 0x262   :  { %666 = dma.done.wait [#allocation4], 256  }
 0x263   :  { %667 = vsyncadd [#allocation4], 4294967040 }
 0x264   :  { %393 = vsyncpa [#allocation3], 1 }
 0x265   :  { %394 = vsyncpa [#allocation6], 1 }
 0x266   :  { %395 = vsyncpa [#allocation9], 1 }
 0x267   :  { %396 = vsyncpa [#allocation4], 1 }

</bundles_post_ra>
